<compile_context>
chip_gen: v6e
topology: v6e:2x2x1
jax: 0.10.0
libtpu: 0.0.40
codegen_flags: <defaults>
</compile_context>

<pallas_src>
import functools

import jax
import jax.numpy as jnp
from jax.experimental import pallas as pl
from jax.experimental.pallas import tpu as pltpu


def _round_up(x, m):
    return (x + m - 1) // m * m


def _wmmb_partial_kernel(pos_ref, mask_ref, msg_ref, out_ref, *,
                         temperature, loss_type):
    # Load native-dtype blocks, cast to f32 in-register (accumulate in f32).
    x = pos_ref[...].astype(jnp.float32) * (1.0 / temperature)          # (bb, C, tt)
    m = (mask_ref[...].astype(jnp.float32) == 1.0).astype(jnp.float32)  # (bb, 1, tt)
    y = msg_ref[...].astype(jnp.float32)                                # (bb, C, 1)

    if loss_type == "bce":
        # Numerically-stable BCEWithLogits: max(x,0) - x*y + log1p(exp(-|x|))
        elem = (jnp.maximum(x, 0.0) - x * y
                + jnp.log1p(jnp.exp(-jnp.abs(x))))
    else:  # "mse"
        d = x - y
        elem = d * d

    # Zero the two detection channels.  The channel weight is a compile-time
    # constant, built here from an iota instead of being streamed from HBM.
    ch = jax.lax.broadcasted_iota(jnp.int32, elem.shape, 1)
    elem = jnp.where(ch >= 2, elem, 0.0)

    # Channel-sum first, then a single tt-wide mask multiply: avoids
    # sublane-broadcasting the (bb, 1, tt) mask across the channel axis and
    # shrinks the final cross-lane reduce input.
    ch_sum = jnp.sum(elem, axis=1, keepdims=True)                       # (bb, 1, tt)
    partial_num = jnp.sum(ch_sum * m)    # masked loss sum over this block
    partial_cnt = jnp.sum(m)             # number of selected (b, t) in this block

    # Row 0 of the (2, 128) output tile holds the numerator, row 1 the mask
    # count (replicated across lanes; the wrapper reads lane 0).
    row = jax.lax.broadcasted_iota(jnp.int32, out_ref.shape, 2)
    out_ref[...] = jnp.where(row == 0, partial_num, partial_cnt)


def _vmem_budget():
    """Explicit VMEM limit + per-(double-buffered)-buffer budget."""
    try:
        cap = int(getattr(pltpu.get_tpu_info(), "vmem_capacity_bytes", 64 << 20))
    except Exception:
        cap = 64 << 20  # most conservative physical size (v7x per-TC)
    # Leave ~25% of physical VMEM for the compiler / small streams / outputs.
    vmem_limit = max(min(int(cap * 0.75), 96 << 20), 32 << 20)
    # Dominant stream (positive) is double-buffered by the pipeline: keep one
    # padded buffer <= ~16 MiB so 2 buffers + mask/message stay well inside
    # the limit on every chip (v5e/v6e 128 MiB, v7x 64 MiB physical).
    per_buf = min(vmem_limit // 3, 16 << 20)
    return vmem_limit, per_buf


def _choose_tiles(bsz, chans, t_len, itemsize, per_buf_budget):
    """Pick (batch_block, time_tile, padded_T) with sublane-padding-aware sizing."""
    # Sublane pack size: 8 rows for 4-byte dtypes, 16 for 2-byte, 32 for 1-byte.
    pack = {4: 8, 2: 16, 1: 32}.get(itemsize, 8)
    chans_pad = _round_up(chans, pack)

    # Bytes of one padded (chans_pad, 128) slab of `positive` per batch row.
    slab_bytes = chans_pad * 128 * itemsize
    tt_cap = max(per_buf_budget // slab_bytes, 1) * 128

    # Zero-pad T (exact: padded mask is 0) and balance the time tiles so tt is
    # a large multiple of 128 with bounded padding waste.
    t_pad128 = _round_up(max(t_len, 1), 128)
    n_t = -(-t_pad128 // tt_cap)                      # ceil
    tt = _round_up(-(-t_pad128 // n_t), 128)
    t_final = tt * n_t

    # Largest batch block (divisor of bsz) whose PADDED block fits the budget.
    bb = 1
    for cand in range(bsz, 0, -1):
        if bsz % cand == 0 and cand * chans_pad * tt * itemsize <= per_buf_budget:
            bb = cand
            break

    # Guarantee >= 2 grid steps so v7x can shard the 'parallel' axes over both
    # TensorCores (a 1-step grid leaves one TC idle).
    if (bsz // bb) * n_t < 2:
        if bsz >= 2:
            for cand in range(bb - 1, 0, -1):
                if bsz % cand == 0:
                    bb = cand
                    break
        elif tt > 128:
            tt = _round_up(tt // 2, 128)
            n_t = -(-t_pad128 // tt)
            t_final = tt * n_t
        # else: bsz == 1 and T <= 128 -> a single step is all there is.

    return bb, tt, t_final


def wmmb_loss(positive, negative, mask, message, *, temperature, loss_type):
    """Pallas port of WMMbLoss.forward. `negative` is unused (as in torch)."""
    del negative  # not used by the reference forward pass
    if message.shape[0] == 0:
        return jnp.array(0.0, jnp.float32)

    bsz, chans, t_len = positive.shape
    nbits = message.shape[1]
    assert chans - 2 == nbits, (
        "in decoding loss: enc and dec don't share nbits, "
        "are you using multi-bit?")

    vmem_limit, per_buf = _vmem_budget()
    bb, tt, t_final = _choose_tiles(bsz, chans, t_len,
                                    positive.dtype.itemsize, per_buf)

    # Zero-pad T to a multiple of the chosen time tile (padded mask == 0, so
    # the result is bit-identical and no divisor search / full-T fallback is
    # needed).
    if t_final != t_len:
        pad = t_final - t_len
        positive = jnp.pad(positive, ((0, 0), (0, 0), (0, pad)))
        mask = jnp.pad(mask, ((0, 0), (0, 0), (0, pad)))

    # Zero-pad the message over the two detection channels so the kernel never
    # slices sublanes; the in-kernel channel weight zeroes their contribution.
    msg_pad = jnp.pad(message, ((0, 0), (2, 0)))[:, :, None]          # (B, C, 1)

    gb, gt = bsz // bb, t_final // tt

    kernel = functools.partial(
        _wmmb_partial_kernel,
        temperature=float(temperature),
        loss_type=loss_type,
    )

    partials = pl.pallas_call(
        kernel,
        out_shape=jax.ShapeDtypeStruct((gb, gt, 2, 128), jnp.float32),
        grid_spec=pltpu.PrefetchScalarGridSpec(
            num_scalar_prefetch=0,
            grid=(gb, gt),
            in_specs=[
                # positive: native dtype, full channels, tiled over (batch, time)
                pl.BlockSpec((bb, chans, tt), lambda i, t: (i, 0, t)),
                # mask
                pl.BlockSpec((bb, 1, tt), lambda i, t: (i, 0, t)),
                # padded message: block index constant in t -> re-DMA'd only
                # when the batch block changes
                pl.BlockSpec((bb, chans, 1), lambda i, t: (i, 0, 0)),
            ],
            out_specs=pl.BlockSpec((1, 1, 2, 128), lambda i, t: (i, t, 0, 0)),
        ),
        compiler_params=pltpu.CompilerParams(
            dimension_semantics=("parallel", "parallel"),
            vmem_limit_bytes=int(vmem_limit)),
    )(positive, mask, msg_pad)

    numer = jnp.sum(partials[:, :, 0, 0])
    count = jnp.sum(partials[:, :, 1, 0])
    denom = count * float(nbits)
    # Guard the all-zero-mask case (the torch reference would produce NaN).
    return jnp.where(denom > 0, numer / denom, 0.0).astype(jnp.float32)


def _reference_loss(positive, mask, message, temperature, loss_type):
    """Pure-JAX reference (same masked-mean formulation)."""
    x = positive[:, 2:, :].astype(jnp.float32) * (1.0 / temperature)
    y = message.astype(jnp.float32)[:, :, None]
    w = (mask.astype(jnp.float32) == 1.0).astype(jnp.float32)
    if loss_type == "bce":
        elem = jnp.maximum(x, 0.0) - x * y + jnp.log1p(jnp.exp(-jnp.abs(x)))
    else:
        elem = (x - y) ** 2
    nbits = message.shape[1]
    return jnp.sum(elem * w) / (jnp.sum(w) * nbits)


if __name__ == "__main__":
    key = jax.random.PRNGKey(0)
    temperature = 0.5
    ok = True

    # Two small configs: one tiny, one with T not a multiple of 128 and an odd
    # batch size (exercises T zero-padding and the >=2-grid-step splitting).
    configs = [
        dict(bsz=2, nbits=4, t_len=16, n_sel=10),
        dict(bsz=3, nbits=4, t_len=200, n_sel=77),
    ]

    for cfg in configs:
        bsz, nbits, t_len, n_sel = (cfg["bsz"], cfg["nbits"],
                                    cfg["t_len"], cfg["n_sel"])
        k1, k2, k3, key = jax.random.split(key, 4)
        positive = jax.random.normal(k1, (bsz, 2 + nbits, t_len), jnp.float32)
        negative = jax.random.normal(k2, (bsz, 2 + nbits, t_len), jnp.float32)
        # Binary watermark mask: same number of selected steps per batch row
        # (the only case where torch's masked_select+reshape is well defined).
        mask = jnp.concatenate(
            [jnp.ones((bsz, 1, n_sel), jnp.float32),
             jnp.zeros((bsz, 1, t_len - n_sel), jnp.float32)], axis=-1)
        message = jax.random.bernoulli(k3, 0.5, (bsz, nbits)).astype(jnp.float32)

        for dtype in (jnp.float32, jnp.bfloat16):   # native-dtype streaming
            pos_d = positive.astype(dtype)
            neg_d = negative.astype(dtype)
            mask_d = mask.astype(dtype)
            msg_d = message.astype(dtype)
            for loss_type in ("bce", "mse"):
                loss = wmmb_loss(pos_d, neg_d, mask_d, msg_d,
                                 temperature=temperature, loss_type=loss_type)
                loss = jax.block_until_ready(loss)
                ref = _reference_loss(pos_d, mask_d, msg_d, temperature, loss_type)
                if not jnp.allclose(loss, ref, rtol=1e-5, atol=1e-5):
                    ok = False
                    print(f"MISMATCH (cfg={cfg}, dtype={jnp.dtype(dtype).name}, "
                          f"{loss_type}): kernel={loss} ref={ref}")

    if ok:
        print("KERNEL_OK")
</pallas_src>

<mosaic_0001>
module attributes {stable_mosaic.version = 11 : i64} {
  func.func @_wmmb_partial_kernel(%arg0: i32, %arg1: i32, %arg2: memref<1x6x128xf32, #tpu.memory_space<vmem>>, %arg3: memref<1x1x128xf32, #tpu.memory_space<vmem>>, %arg4: memref<1x6x1xf32, #tpu.memory_space<vmem>>, %arg5: memref<1x1x2x128xf32, #tpu.memory_space<vmem>>) attributes {dimension_semantics = [#tpu.dimension_semantics<parallel>, #tpu.dimension_semantics<parallel>], iteration_bounds = array<i64: 2, 1>, scalar_prefetch = 0 : i64, scratch_operands = 0 : i64, tpu.core_type = #tpu.core_type<tc>, window_params = [{transform_indices = @transform_0, window_bounds = array<i64: 1, 6, 128>}, {transform_indices = @transform_1, window_bounds = array<i64: 1, 1, 128>}, {transform_indices = @transform_2, window_bounds = array<i64: 1, 6, 1>}, {transform_indices = @transform_3, window_bounds = array<i64: 1, 1, 2, 128>}]} {
    %c0 = arith.constant 0 : index
    %c0_0 = arith.constant 0 : index
    %c0_1 = arith.constant 0 : index
    %0 = vector.load %arg2[%c0, %c0_0, %c0_1] : memref<1x6x128xf32, #tpu.memory_space<vmem>>, vector<1x6x128xf32>
    %cst = arith.constant 2.000000e+00 : f32
    %1 = vector.broadcast %cst : f32 to vector<1x6x128xf32>
    %2 = arith.mulf %0, %1 : vector<1x6x128xf32>
    %c0_2 = arith.constant 0 : index
    %c0_3 = arith.constant 0 : index
    %c0_4 = arith.constant 0 : index
    %3 = vector.load %arg3[%c0_2, %c0_3, %c0_4] : memref<1x1x128xf32, #tpu.memory_space<vmem>>, vector<1x1x128xf32>
    %cst_5 = arith.constant 1.000000e+00 : f32
    %4 = vector.broadcast %cst_5 : f32 to vector<1x1x128xf32>
    %5 = arith.cmpf oeq, %3, %4 : vector<1x1x128xf32>
    %6 = arith.extui %5 : vector<1x1x128xi1> to vector<1x1x128xi32>
    %7 = arith.sitofp %6 : vector<1x1x128xi32> to vector<1x1x128xf32>
    %c0_6 = arith.constant 0 : index
    %c0_7 = arith.constant 0 : index
    %c0_8 = arith.constant 0 : index
    %8 = vector.load %arg4[%c0_6, %c0_7, %c0_8] : memref<1x6x1xf32, #tpu.memory_space<vmem>>, vector<1x6x1xf32>
    %cst_9 = arith.constant 0.000000e+00 : f32
    %9 = vector.broadcast %cst_9 : f32 to vector<1x6x128xf32>
    %10 = arith.maximumf %2, %9 : vector<1x6x128xf32>
    %11 = vector.broadcast %8 : vector<1x6x1xf32> to vector<1x6x128xf32>
    %12 = arith.mulf %2, %11 : vector<1x6x128xf32>
    %13 = arith.subf %10, %12 : vector<1x6x128xf32>
    %14 = math.absf %2 : vector<1x6x128xf32>
    %cst_10 = arith.constant 0.000000e+00 : f32
    %15 = vector.broadcast %cst_10 : f32 to vector<1x6x128xf32>
    %16 = arith.subf %15, %14 : vector<1x6x128xf32>
    %17 = math.exp %16 : vector<1x6x128xf32>
    %18 = math.log1p %17 : vector<1x6x128xf32>
    %19 = arith.addf %13, %18 : vector<1x6x128xf32>
    %20 = tpu.iota {dimensions = array<i32: 1>} : vector<1x6x128xi32>
    %c2_i32 = arith.constant 2 : i32
    %21 = vector.broadcast %c2_i32 : i32 to vector<1x6x128xi32>
    %22 = arith.cmpi sge, %20, %21 : vector<1x6x128xi32>
    %cst_11 = arith.constant 0.000000e+00 : f32
    %23 = vector.broadcast %cst_11 : f32 to vector<1x6x128xf32>
    %24 = arith.select %22, %19, %23 : vector<1x6x128xi1>, vector<1x6x128xf32>
    %cst_12 = arith.constant dense<0.000000e+00> : vector<1x128xf32>
    %25 = vector.multi_reduction <add>, %24, %cst_12 [1] : vector<1x6x128xf32> to vector<1x128xf32>
    %26 = vector.shape_cast %25 : vector<1x128xf32> to vector<1x1x128xf32>
    %27 = arith.mulf %26, %7 : vector<1x1x128xf32>
    %28 = vector.shape_cast %27 : vector<1x1x128xf32> to vector<1x1x1x128xf32>
    %cst_13 = arith.constant dense<0.000000e+00> : vector<1xf32>
    %29 = vector.multi_reduction <add>, %28, %cst_13 [1, 2, 3] : vector<1x1x1x128xf32> to vector<1xf32>
    %30 = vector.shape_cast %29 : vector<1xf32> to vector<1x1x1x1xf32>
    %31 = vector.extract %30[0, 0, 0, 0] : f32 from vector<1x1x1x1xf32>
    %32 = vector.shape_cast %7 : vector<1x1x128xf32> to vector<1x1x1x128xf32>
    %cst_14 = arith.constant dense<0.000000e+00> : vector<1xf32>
    %33 = vector.multi_reduction <add>, %32, %cst_14 [1, 2, 3] : vector<1x1x1x128xf32> to vector<1xf32>
    %34 = vector.shape_cast %33 : vector<1xf32> to vector<1x1x1x1xf32>
    %35 = vector.extract %34[0, 0, 0, 0] : f32 from vector<1x1x1x1xf32>
    %36 = tpu.iota {dimensions = array<i32: 2>} : vector<1x1x2x128xi32>
    %c0_i32 = arith.constant 0 : i32
    %37 = vector.broadcast %c0_i32 : i32 to vector<1x1x2x128xi32>
    %38 = arith.cmpi eq, %36, %37 : vector<1x1x2x128xi32>
    %39 = vector.broadcast %31 : f32 to vector<1x1x2x128xf32>
    %40 = vector.broadcast %35 : f32 to vector<1x1x2x128xf32>
    %41 = arith.select %38, %39, %40 : vector<1x1x2x128xi1>, vector<1x1x2x128xf32>
    %c0_15 = arith.constant 0 : index
    %c0_16 = arith.constant 0 : index
    %c0_17 = arith.constant 0 : index
    %c0_18 = arith.constant 0 : index
    %42 = vector.load %arg5[%c0_15, %c0_16, %c0_17, %c0_18] : memref<1x1x2x128xf32, #tpu.memory_space<vmem>>, vector<1x1x2x128xf32>
    tpu.vector_store %arg5[%c0_15, %c0_16, %c0_17, %c0_18], %41 {strides = array<i32>} : memref<1x1x2x128xf32, #tpu.memory_space<vmem>>, vector<1x1x2x128xf32>,
    return
  }
  func.func @transform_0(%arg0: i32, %arg1: i32) -> (i32, i32, i32) {
    %c0_i32 = arith.constant 0 : i32
    %c0_i32_0 = arith.constant 0 : i32
    return %arg0, %c0_i32, %arg1 : i32, i32, i32
  }
  func.func @transform_1(%arg0: i32, %arg1: i32) -> (i32, i32, i32) {
    %c0_i32 = arith.constant 0 : i32
    %c0_i32_0 = arith.constant 0 : i32
    return %arg0, %c0_i32, %arg1 : i32, i32, i32
  }
  func.func @transform_2(%arg0: i32, %arg1: i32) -> (i32, i32, i32) {
    %c0_i32 = arith.constant 0 : i32
    %c0_i32_0 = arith.constant 0 : i32
    %c0_i32_1 = arith.constant 0 : i32
    return %arg0, %c0_i32, %c0_i32_0 : i32, i32, i32
  }
  func.func @transform_3(%arg0: i32, %arg1: i32) -> (i32, i32, i32, i32) {
    %c0_i32 = arith.constant 0 : i32
    %c0_i32_0 = arith.constant 0 : i32
    %c0_i32_1 = arith.constant 0 : i32
    return %arg0, %arg1, %c0_i32, %c0_i32_0 : i32, i32, i32, i32
  }
}

</mosaic_0001>

<bundles_post_ra>
// kernel: tpu_custom_call.1
= control target key start
LH: loop header
LB: loop body
LE: loop exit
PB: predicated region body
PF: predicated region fallthrough
CT: control target
= control target key end

     0   :  { %8 = vsyncpa [#allocation3], 0  ;;  %s704_s0 = inlined_call_operand.vmem [shape: f32[2,6,128], index: 0, kind: input, shape index: {}]   ;;  %s705_s1 = inlined_call_operand.vmem [shape: f32[2,1,128], index: 1, kind: input, shape index: {}]   ;;  %s706_s2 = inlined_call_operand.vmem [shape: f32[2,6,1], index: 2, kind: input, shape index: {}]   ;;  %s707_s3 = inlined_call_operand.hbm [shape: f32[2,1,2,128], index: 3, kind: output, shape index: {}]  }
   0x1   :  { %10 = vsyncpa [#allocation3 + $0x1], 0  ;;  %s591_s12 = smov 0   ;;  %s593_s13 = smov 0  }
   0x2   :  { %s595_s14 = smov 0   ;;  %s597_s15 = smov 0  }
   0x3   :  { %s599_s16 = smov 0   ;;  %s601_s17 = smov 0  }
   0x4 LB: > { %s411_s18 = sadd.s32 4294967295, %s566_s17   ;;  %s412_s19 = sadd.s32 4294967294, %s566_s17   ;;  %s566_s17 = sphi %s601_s17, %s16_s17   ;;  %s562_s16 = sphi %s599_s16, %s714_s16   ;;  %s558_s15 = sphi %s597_s15, %s713_s15   ;;  %s554_s14 = sphi %s595_s14, %s712_s14   ;;  %s550_s13 = sphi %s593_s13, %s711_s13   ;;  %s546_s12 = sphi %s591_s12, %s710_s12  }
   0x5   : > { %s28_s20 = sadd.s32 1, %s562_s16  ;;  %s119_s21 = sadd.s32 1, %s554_s14 }
   0x6   : > { %p30_p0 = scmp.ge.s32.totalorder %s28_s20, 2  ;;  %p129_p1 = scmp.ne.s32.totalorder %s554_s14, %s550_s13 }
   0x7   : > { %p130_p2 = scmp.eq.s32.totalorder %s411_s18, 1  ;;  %p135_p3 = scmp.ne.s32.totalorder %s550_s13, %s546_s12 }
   0x8   : > { %s716_s20 = smov (%p30_p0, %s28_s20), 0  ;;  %p136_p5 = scmp.eq.s32.totalorder %s412_s19, 1 }
   0x9   : > { %p631_p4 = por %p130_p2, %p129_p1  ;;  %s114_s23 = ssub.s32 %s562_s16, %s716_s20 }
   0xa   : > { %p415_p6 = scmp.ge.s32.totalorder %s566_s17, 1  ;;  %p117_p7 = scmp.eq.s32.totalorder %s114_s23, 0 }
   0xb   : > { %p638_p8 = por %p136_p5, %p135_p3  ;;  %p180_p9 = scmp.lt.s32.totalorder %s566_s17, 3 }
   0xc   : > { %s644_s25 = scalar_select %p117_p7, %s554_s14, %s119_s21  }
   0xd   : > { %p181_p10 = pnand %p415_p6, %p180_p9 }
   0xe   : > { %p216_p11 = scmp.lt.s32.totalorder (!%p181_p10), %s558_s15, 1  ;;  %s213_s10 = sand.u32 (!%p181_p10), 1, %s550_s13  }
   0xf   : > { %184 = sbr.rel (%p181_p10) target bundleno = 388 (0x184), region = 32  ;;  %s416_s11 = sshll.u32 (!%p181_p10), %s213_s10, 1 }
  0x10   : > { %s421_s18 = sshll.u32 (!%p181_p10), %s558_s15, 5  ;;  %s215_s19 = scalar_lea.vmem (!%p181_p10), [#allocation2], %s416_s11 }
  0x11   : > { %s316_s21 = sshll.u32 (!%p181_p10), %s215_s19, 4  ;;  %s664_s29 = scalar_lea.hbm (!%p181_p10), %s707_s3, %s421_s18  ;;  %s317_s21 = int_to_ptr.vmem [resolvable:$true] %s316_s21 }
  0x12   : > { %s490_s4 = scalar_lea.vmem (!%p181_p10), %s317_s21, 32 }
  0x13   : > { %p491_p12 = scmp.ne.s32.totalorder (!%p181_p10), %s317_s21, %s490_s4 }
  0x14   : > { %v568_v0 = vmov 0   ;;  %s217_s26 = scalar_select %p216_p11, %s558_s15, 1  ;;  %vm275_vm0 = vcmask 1040384   ;;  %v569_v3 = vmov 0.0   ;;  %v262_v17 = vlaneseq }
  0x15   : > { %485 = vset.pattern.permute.xlu0 %v568_v0  ;;  %vm266_vm4 = vcmask 1045504   ;;  %p492_p13 = pnand %p491_p12, %p631_p4  ;;  %s570_s15 = smov [#allocation2]  }
  0x16   : > { %s417_s27 = sshll.u32 %s217_s26, 3  ;;  %s228_s6 = scalar_lea.vmem %s705_s1, %s217_s26  ;;  %v263_v21 = vshrl.u32 %v262_v17, 7 }
  0x17   : > { %s232_s30 = scalar_lea.vmem %s706_s2, %s417_s27  ;;  %v235_v2 = vld [vmem:[%s228_s6] sm:$0x1]  ;;  %s222_s9 = scalar_lea.vmem %s704_s0, %s417_s27 }
  0x18   : > { %v239_v1 = vld [vmem:[%s232_s30] sm:$0x3f]  ;;  %vm236_vm1 = vcmp.eq.f32.partialorder %v235_v2, 1.0  ;;  %vm264_vm3 = vcmp.ge.s32.totalorder %v263_v21, 2  ;;  %vm296_vm5 = vcmp.eq.s32.totalorder %v263_v21, 0  ;;  %s302_s30 = scalar_lea.sflag [#allocation3], %s213_s10  ;;  %p493_p0 = pneg %p492_p13 }
  0x19   : > { %243 = vperm.xlu0 %485, %v239_v1   ;;  %v419_v4 = vsel %vm236_vm1, 1.0, %v569_v3  ;;  %v233_v6 = vld [vmem:[%s222_s9] sm:$0x3f]  ;;  %s494_s5 = sshll.u32 %s570_s15, 4  ;;  %s495_s5 = int_to_ptr.vmem [resolvable:$false] %s494_s5 }
  0x1a   : > { %v286_v5 = vsel %vm275_vm0, %v419_v4, 0.0  ;;  %v234_v7 = vmul.f32 2.0, %v233_v6  ;;  %s496_s6 = scalar_lea.vmem %s495_s5, 64  ;;  %p497_p1 = scmp.lt.s32.totalorder %s317_s21, %s495_s5 }
  0x1b   : > { %287 = vadd.xlane.f32.xlu1 %v286_v5  ;;  %p498_p2 = scmp.lt.s32.totalorder %s496_s6, %s490_s4 }
  0x1c   : > { %v248_v8 = vand.u32 2147483647, %v234_v7  ;;  %v240_v20 = vmax.f32 %v234_v7, 0.0 }
  0x1d   : > { %p499_p3 = por %p498_p2, %p497_p1 }
  0x1e   : > { %v249_v9 = vsub.f32 0.0, %v248_v8 }
  0x1f   : > { %p500_p5 = pnand %p499_p3, %p493_p0 }
  0x20   : > { %v250_v10 = vmul.f32 1.442695, %v249_v9 }
  0x22   : > { %486 = vpow2.f32 %v250_v10 }
  0x2f   : > { %v487_v11 = vpop.eup %486 }
  0x30   : > { %v252_v12 = vadd.f32 1.0, %v487_v11  ;;  %v255_v13 = vmul.f32 -0.5, %v487_v11  ;;  %v258_v16 = vand.u32 2147483647, %v487_v11 }
  0x32   : > { %488 = vlog2.f32 %v252_v12  ;;  %v256_v14 = vadd.f32 1.0, %v255_v13  ;;  %vm259_vm2 = vcmp.lt.f32.partialorder %v258_v16, 0.0004427343 }
  0x34   : > { %v257_v19 = vmul.f32 %v487_v11, %v256_v14 }
  0x3f   : > { %v489_v15 = vpop.eup %488 }
  0x40   : > { %v254_v18 = vmul.f32 0.6931472, %v489_v15 }
  0x42   : > { %v260_v24 = vsel %vm259_vm2, %v257_v19, %v254_v18 }
  0x94   : > { %v244_v22 = vpop.permute.xlu0 %243 }
  0x95   : > { %v246_v23 = vmul.f32 %v244_v22, %v234_v7 }
  0x97   : > { %v247_v25 = vsub.f32 %v240_v20, %v246_v23 }
  0x99   : > { %v261_v26 = vadd.f32 %v260_v24, %v247_v25 }
  0x9b   : > { %v265_v27 = vsel %vm264_vm3, %v261_v26, 0.0 }
  0x9c   : > { %v267_v28 = vsel %vm266_vm4, %v265_v27, 0.0 }
  0x9d   : > { %v268_v29 = vrot.slane %v267_v28, 4 }
  0x9f   : > { %v269_v30 = vadd.f32 %v268_v29, %v267_v28 }
  0xa1   : > { %v270_v31 = vrot.slane %v269_v30, 2 }
  0xa3   : > { %v271_v32 = vadd.f32 %v270_v31, %v269_v30 }
  0xa4   : > { %v288_v37 = vpop.xlane.xlu1 %287 }
  0xa5   : > { %v272_v33 = vrot.slane %v271_v32, 1  ;;  %v289_v38 = vrot.slane %v288_v37, 4 }
  0xa7   : > { %v273_v34 = vadd.f32 %v272_v33, %v271_v32  ;;  %v290_v39 = vadd.f32 %v289_v38, %v288_v37 }
  0xa9   : > { %v274_v35 = vmul.f32 %v419_v4, %v273_v34  ;;  %v291_v40 = vrot.slane %v290_v39, 2 }
  0xab   : > { %v276_v36 = vsel %vm275_vm0, %v274_v35, 0.0  ;;  %v292_v44 = vadd.f32 %v291_v40, %v290_v39 }
  0xac   : > { %277 = vadd.xlane.f32.xlu0 %v276_v36 }
  0xad   : > { %v293_v47 = vrot.slane %v292_v44, 1 }
  0xaf   : > { %v294_v50 = vadd.f32 %v293_v47, %v292_v44 }
 0x135   : > { %v278_v41 = vpop.xlane.xlu0 %277 }
 0x136   : > { %v279_v42 = vrot.slane %v278_v41, 4 }
 0x138   : > { %v280_v43 = vadd.f32 %v279_v42, %v278_v41 }
 0x13a   : > { %v281_v45 = vrot.slane %v280_v43, 2 }
 0x13c   : > { %v282_v46 = vadd.f32 %v281_v45, %v280_v43 }
 0x13e   : > { %v283_v48 = vrot.slane %v282_v46, 1 }
 0x140   : > { %v284_v49 = vadd.f32 %v283_v48, %v282_v46 }
 0x142   : > { %424 = vpush %v284_v49 }
 0x143   : > { %426 = vpush %v294_v50 }
 0x173   : > { %s425_s23 = spop %424 }
 0x174   : > { %v297_v51 = vstv %s425_s23  ;;  %s427_s26 = spop %426 }
 0x175   : > { %v298_v52 = vstv %s427_s26 }
 0x176   : > { %v299_v53 = vsel %vm296_vm5, %v297_v51, %v298_v52 }
 0x177   : > { %300 = vst [vmem:[%s215_s19] sm:$0x3] %v299_v53 }
 0x178   : > { %503 = shalt.err (!%p500_p5)
}
 0x179   : > { %s504_s7 = scalar_lea.hbm %s664_s29, 32  ;;  %s508_s10 = scalar_lea.hbm %s707_s3, 64 }
 0x17a   : > { %p505_p6 = scmp.ne.s32.totalorder %s664_s29, %s504_s7  ;;  %p509_p10 = scmp.lt.s32.totalorder %s664_s29, %s707_s3 }
 0x17b   : > { %p510_p11 = scmp.lt.s32.totalorder %s508_s10, %s504_s7 }
 0x17c   : > { %p506_p7 = pnand %p505_p6, %p631_p4 }
 0x17d   : > { %p511_p12 = por %p510_p11, %p509_p10 }
 0x17e   : > { %p507_p9 = pneg %p506_p7 }
 0x180   : > { %p512_p13 = pnand %p511_p12, %p507_p9 }
 0x182   : > { %515 = shalt.err (!%p512_p13)
}
 0x183   : > { %428 = dma.vmem_to_hbm [thread:$0]  (%p631_p4), %s317_s21, 32, %s664_s29, %s302_s30  }
 0x184 PF: > { %p434_p0 = scmp.ge.s32.totalorder %s566_s17, 2  ;;  %s328_s19 = sand.u32 1, %s546_s12  }
 0x185   : > { %s329_s23 = scalar_lea.sflag [#allocation3], %s328_s19 }
 0x186   : > { %p431_p1 = pnand %p434_p0, %p638_p8 }
 0x188   : > { %p432_p2 = pneg %p431_p1 }
 0x18a   : > { %541 = dma.done.wait (%p432_p2), %s329_s23, 32  }
 0x18b   : > { %543 = vsyncadd (%p432_p2), %s329_s23, 4294967264  ;;  %s16_s17 = sadd.s32 1, %s566_s17   ;;  %s710_s12 = smov %s550_s13 }
 0x18c   : > { %p13_p3 = scmp.ge.s32.totalorder %s16_s17, 4   ;;  %s711_s13 = smov %s554_s14 }
 0x18d   : > { %s712_s14 = smov %s644_s25  ;;  %s713_s15 = smov %s562_s16 }
 0x18e   : > { %s714_s16 = smov %s716_s20  ;;  %15 = sbr.rel (!%p13_p3) target bundleno = 4 (0x4), region = 73 }
 0x193   :  { %334 = vsyncpa [#allocation3], 1 }
 0x194   :  { %336 = vsyncpa [#allocation3 + $0x1], 1 }

</bundles_post_ra>
